<compile_context>
chip_gen: v7x
topology: tpu7x:2x2x1
jax: 0.10.0
libtpu: 0.0.40
codegen_flags: <defaults>
</compile_context>

<pallas_src>
import jax
import jax.numpy as jnp
from jax.experimental import pallas as pl
from jax.experimental.pallas import tpu as pltpu

IN_CHANNELS = 32
FC_DIM = 128
HID2 = FC_DIM // 2
NUM_LABELS = 1
BN_EPS = 1e-5
NEG_SLOPE = 0.01  # nn.LeakyReLU default

LANES = 128
DEFAULT_TILE_N = 8192  # ~10-12 MB live set -> comfortably under the 32 MiB VMEM limit.


def _leaky_relu(x):
    # 2 VPU ops (mul, max) instead of 3 (cmp, mul, select); valid for slope in [0, 1].
    return jnp.maximum(x, NEG_SLOPE * x)


def _round_up(a, b):
    return pl.cdiv(a, b) * b


def texturenet_kernel(x_ref, w1_ref, b1_ref, w2_ref, b2_ref, w3_ref, b3_ref, o_ref):
    # x tile: (TILE_N, 32) f32 streamed from HBM; bf16 cast done in-kernel (avoids a
    # separate XLA astype pass and its extra HBM round trip).
    x = x_ref[...].astype(jnp.bfloat16)

    # ---- block 1: Linear(+folded BN), f32 MXU accumulate, bf16 epilogue ----
    h1 = jnp.dot(x, w1_ref[...], preferred_element_type=jnp.float32) + b1_ref[...]
    h1 = _leaky_relu(h1.astype(jnp.bfloat16))  # bf16 LeakyReLU; also the dtype MXU wants

    # ---- block 2: Linear(+folded BN) -> LeakyReLU (f32 epilogue, small) ----
    h2 = jnp.dot(h1, w2_ref[...], preferred_element_type=jnp.float32) + b2_ref[...]
    h2 = _leaky_relu(h2)

    # ---- head: 64 -> 1 on VPU + XLU, written lane-dense ----
    # Split the batch rows (tile,) -> (rows, 128) so the result is a full (rows, 128)
    # slab (unmasked vst) instead of a (tile, 1) column of masked stores.
    rows = o_ref.shape[1]
    h2r = h2.reshape(rows, LANES, HID2)                    # free leading-dim split
    logit = jnp.sum(h2r * w3_ref[...], axis=-1) + b3_ref[...]   # (rows, 128) f32
    o_ref[...] = logit[None]                                     # (1, rows, 128)


def fold_params(p):
    """Fold eval-mode BatchNorm into the Linear layers; matmul weights in bf16."""
    w1 = (p["w1"] * p["s1"]).astype(jnp.bfloat16)            # (32, 128)
    b1 = (p["b1"] * p["s1"] + p["t1"]).astype(jnp.float32)   # (1, 128)
    w2 = (p["w2"] * p["s2"]).astype(jnp.bfloat16)            # (128, 64)
    b2 = (p["b2"] * p["s2"] + p["t2"]).astype(jnp.float32)   # (1, 64)
    w3 = p["w3"].T.astype(jnp.float32)                       # (1, 64) head row-vector
    b3 = p["b3"].astype(jnp.float32)                          # (1, 1)
    return dict(w1=w1, b1=b1, w2=w2, b2=b2, w3=w3, b3=b3)


def texturenet_forward(x, folded, *, tile_n=DEFAULT_TILE_N):
    """x: (N, in_channels) float -> logit: (N, num_labels) float32."""
    n = x.shape[0]
    x = x.astype(jnp.float32)  # no-op for f32 inputs; bf16 cast happens in-kernel

    # Tile is a multiple of 128 (lane-dense output slab), no larger than needed.
    tile_n = _round_up(tile_n, LANES)
    tile = min(tile_n, _round_up(n, LANES))
    num_tiles = pl.cdiv(n, tile)
    rows = tile // LANES
    n_pad = num_tiles * tile

    # Only tiny inputs (n < tile) are padded (<= 127 rows) so every block start is
    # in-bounds.  For n >= tile the last block is ragged: Pallas copies just the valid
    # region; garbage rows only produce garbage logits that are sliced off below.
    if n < tile:
        x = jnp.pad(x, ((0, tile - n), (0, 0)))

    def const2d(shape):
        # Whole-array block, same block index every step -> stays VMEM-resident.
        return pl.BlockSpec(shape, lambda i: (0, 0))

    out = pl.pallas_call(
        texturenet_kernel,
        out_shape=jax.ShapeDtypeStruct((num_tiles, rows, LANES), jnp.float32),
        grid=(num_tiles,),
        in_specs=[
            pl.BlockSpec((tile, IN_CHANNELS), lambda i: (i, 0)),  # streamed x tiles
            const2d((IN_CHANNELS, FC_DIM)),   # w1 (bf16)
            const2d((1, FC_DIM)),             # b1
            const2d((FC_DIM, HID2)),          # w2 (bf16)
            const2d((1, HID2)),               # b2
            const2d((1, HID2)),               # w3 row-vector
            const2d((1, 1)),                  # b3
        ],
        out_specs=pl.BlockSpec((1, rows, LANES), lambda i: (i, 0, 0)),
        compiler_params=pltpu.CompilerParams(
            dimension_semantics=("parallel",),   # shard batch tiles across TCs on v7x
            vmem_limit_bytes=32 * 1024 * 1024,   # > v5e's 16 MiB default; safe everywhere
        ),
    )(x, folded["w1"], folded["b1"], folded["w2"], folded["b2"],
      folded["w3"], folded["b3"])

    # Lane-dense slab -> (N, 1) logits; tiny tensor, negligible reshape/slice.
    return out.reshape(n_pad, 1)[:n]


def texturenet_apply(data, folded, *, tile_n=DEFAULT_TILE_N):
    """Mirrors TextureNet.forward: dict in, dict out."""
    return {"logit": texturenet_forward(data["texture_features"], folded, tile_n=tile_n)}


def init_params(key):
    """Deterministic synthetic parameters matching the PyTorch module's shapes."""
    ks = jax.random.split(key, 12)

    def linear(kw, kb, fan_in, fan_out):
        bound = 1.0 / jnp.sqrt(fan_in)
        w = jax.random.uniform(kw, (fan_in, fan_out), jnp.float32, -bound, bound)
        b = jax.random.uniform(kb, (1, fan_out), jnp.float32, -bound, bound)
        return w, b

    def bn_fold(kg, kbeta, km, kv, dim):
        gamma = 1.0 + 0.1 * jax.random.normal(kg, (1, dim), jnp.float32)
        beta = 0.1 * jax.random.normal(kbeta, (1, dim), jnp.float32)
        mean = 0.1 * jax.random.normal(km, (1, dim), jnp.float32)
        var = jnp.abs(1.0 + 0.1 * jax.random.normal(kv, (1, dim), jnp.float32))
        scale = gamma / jnp.sqrt(var + BN_EPS)
        shift = beta - mean * scale
        return scale, shift

    w1, b1 = linear(ks[0], ks[1], IN_CHANNELS, FC_DIM)
    s1, t1 = bn_fold(ks[2], ks[3], ks[4], ks[5], FC_DIM)
    w2, b2 = linear(ks[6], ks[7], FC_DIM, HID2)
    s2, t2 = bn_fold(ks[8], ks[9], ks[10], ks[11], HID2)
    w3, b3 = linear(
        jax.random.fold_in(key, 100), jax.random.fold_in(key, 101), HID2, NUM_LABELS
    )
    return dict(w1=w1, b1=b1, s1=s1, t1=t1,
                w2=w2, b2=b2, s2=s2, t2=t2,
                w3=w3, b3=b3)


def texturenet_reference(x, p):
    """Pure-JAX f32 reference with unfolded BN (eval mode)."""
    h1 = jnp.maximum((x @ p["w1"] + p["b1"]) * p["s1"] + p["t1"],
                     NEG_SLOPE * ((x @ p["w1"] + p["b1"]) * p["s1"] + p["t1"]))
    h2 = jnp.maximum((h1 @ p["w2"] + p["b2"]) * p["s2"] + p["t2"],
                     NEG_SLOPE * ((h1 @ p["w2"] + p["b2"]) * p["s2"] + p["t2"]))
    return h2 @ p["w3"] + p["b3"]


if __name__ == "__main__":
    key = jax.random.PRNGKey(0)
    k_x1, k_x2, k_p = jax.random.split(key, 3)

    params = init_params(k_p)
    folded = fold_params(params)

    # Case 1: tiny batch -> single 128-row tile (input padded by <128 rows).
    x1 = jax.random.normal(k_x1, (8, IN_CHANNELS), jnp.float32)
    y1 = jax.block_until_ready(texturenet_forward(x1, folded))
    ref1 = texturenet_reference(x1, params)
    assert y1.shape == (8, NUM_LABELS)
    assert jnp.allclose(y1, ref1, atol=5e-2, rtol=5e-2), "mismatch (case 1)"

    # Case 2: multi-step grid (3 tiles of 128) with a ragged last block, no input pad.
    x2 = jax.random.normal(k_x2, (300, IN_CHANNELS), jnp.float32)
    y2 = jax.block_until_ready(texturenet_forward(x2, folded, tile_n=128))
    ref2 = texturenet_reference(x2, params)
    assert y2.shape == (300, NUM_LABELS)
    assert jnp.allclose(y2, ref2, atol=5e-2, rtol=5e-2), "mismatch (case 2)"

    print("KERNEL_OK")
</pallas_src>

<mosaic_0001>
module attributes {stable_mosaic.version = 11 : i64} {
  func.func @texturenet_kernel(%arg0: i32, %arg1: memref<128x32xf32, #tpu.memory_space<vmem>>, %arg2: memref<32x128xbf16, #tpu.memory_space<vmem>>, %arg3: memref<1x128xf32, #tpu.memory_space<vmem>>, %arg4: memref<128x64xbf16, #tpu.memory_space<vmem>>, %arg5: memref<1x64xf32, #tpu.memory_space<vmem>>, %arg6: memref<1x64xf32, #tpu.memory_space<vmem>>, %arg7: memref<1x1xf32, #tpu.memory_space<vmem>>, %arg8: memref<1x1x128xf32, #tpu.memory_space<vmem>>) attributes {dimension_semantics = [#tpu.dimension_semantics<parallel>], iteration_bounds = array<i64: 1>, scalar_prefetch = 0 : i64, scratch_operands = 0 : i64, tpu.core_type = #tpu.core_type<tc>, window_params = [{transform_indices = @transform_0, window_bounds = array<i64: 128, 32>}, {pipeline_mode = #tpu.pipeline_mode<synchronous>, transform_indices = @transform_1, window_bounds = array<i64: 32, 128>}, {pipeline_mode = #tpu.pipeline_mode<synchronous>, transform_indices = @transform_2, window_bounds = array<i64: 1, 128>}, {pipeline_mode = #tpu.pipeline_mode<synchronous>, transform_indices = @transform_3, window_bounds = array<i64: 128, 64>}, {pipeline_mode = #tpu.pipeline_mode<synchronous>, transform_indices = @transform_4, window_bounds = array<i64: 1, 64>}, {pipeline_mode = #tpu.pipeline_mode<synchronous>, transform_indices = @transform_5, window_bounds = array<i64: 1, 64>}, {pipeline_mode = #tpu.pipeline_mode<synchronous>, transform_indices = @transform_6, window_bounds = array<i64: 1, 1>}, {transform_indices = @transform_7, window_bounds = array<i64: 1, 1, 128>}]} {
    %c0 = arith.constant 0 : index
    %c0_0 = arith.constant 0 : index
    %0 = vector.load %arg1[%c0, %c0_0] : memref<128x32xf32, #tpu.memory_space<vmem>>, vector<128x32xf32>
    %1 = arith.truncf %0 : vector<128x32xf32> to vector<128x32xbf16>
    %c0_1 = arith.constant 0 : index
    %c0_2 = arith.constant 0 : index
    %2 = vector.load %arg2[%c0_1, %c0_2] : memref<32x128xbf16, #tpu.memory_space<vmem>>, vector<32x128xbf16>
    %cst = arith.constant dense<0.000000e+00> : vector<128x128xf32>
    %3 = tpu.matmul %1, %2, %cst {dimension_numbers = #tpu.dot_dimension_numbers<[1], [0], [0], [1], [0, 0, 1, 1], [], []>} : vector<128x32xbf16>, vector<32x128xbf16>, vector<128x128xf32> -> vector<128x128xf32>
    %c0_3 = arith.constant 0 : index
    %c0_4 = arith.constant 0 : index
    %4 = vector.load %arg3[%c0_3, %c0_4] : memref<1x128xf32, #tpu.memory_space<vmem>>, vector<1x128xf32>
    %5 = vector.broadcast %4 : vector<1x128xf32> to vector<128x128xf32>
    %6 = arith.addf %3, %5 : vector<128x128xf32>
    %7 = arith.truncf %6 : vector<128x128xf32> to vector<128x128xbf16>
    %cst_5 = arith.constant 1.000980e-02 : bf16
    %8 = vector.broadcast %cst_5 : bf16 to vector<128x128xbf16>
    %9 = arith.mulf %8, %7 : vector<128x128xbf16>
    %10 = arith.maximumf %7, %9 : vector<128x128xbf16>
    %c0_6 = arith.constant 0 : index
    %c0_7 = arith.constant 0 : index
    %11 = vector.load %arg4[%c0_6, %c0_7] : memref<128x64xbf16, #tpu.memory_space<vmem>>, vector<128x64xbf16>
    %cst_8 = arith.constant dense<0.000000e+00> : vector<128x64xf32>
    %12 = tpu.matmul %10, %11, %cst_8 {dimension_numbers = #tpu.dot_dimension_numbers<[1], [0], [0], [1], [0, 0, 1, 1], [], []>} : vector<128x128xbf16>, vector<128x64xbf16>, vector<128x64xf32> -> vector<128x64xf32>
    %c0_9 = arith.constant 0 : index
    %c0_10 = arith.constant 0 : index
    %13 = vector.load %arg5[%c0_9, %c0_10] : memref<1x64xf32, #tpu.memory_space<vmem>>, vector<1x64xf32>
    %14 = vector.broadcast %13 : vector<1x64xf32> to vector<128x64xf32>
    %15 = arith.addf %12, %14 : vector<128x64xf32>
    %cst_11 = arith.constant 0.00999999977 : f32
    %16 = vector.broadcast %cst_11 : f32 to vector<128x64xf32>
    %17 = arith.mulf %16, %15 : vector<128x64xf32>
    %18 = arith.maximumf %15, %17 : vector<128x64xf32>
    %19 = vector.shape_cast %18 : vector<128x64xf32> to vector<1x128x64xf32>
    %c0_12 = arith.constant 0 : index
    %c0_13 = arith.constant 0 : index
    %20 = vector.load %arg6[%c0_12, %c0_13] : memref<1x64xf32, #tpu.memory_space<vmem>>, vector<1x64xf32>
    %21 = vector.shape_cast %20 : vector<1x64xf32> to vector<1x1x64xf32>
    %22 = vector.broadcast %21 : vector<1x1x64xf32> to vector<1x128x64xf32>
    %23 = arith.mulf %19, %22 : vector<1x128x64xf32>
    %cst_14 = arith.constant dense<0.000000e+00> : vector<1x128xf32>
    %24 = vector.multi_reduction <add>, %23, %cst_14 [2] : vector<1x128x64xf32> to vector<1x128xf32>
    %c0_15 = arith.constant 0 : index
    %c0_16 = arith.constant 0 : index
    %25 = vector.load %arg7[%c0_15, %c0_16] : memref<1x1xf32, #tpu.memory_space<vmem>>, vector<1x1xf32>
    %26 = vector.broadcast %25 : vector<1x1xf32> to vector<1x128xf32>
    %27 = arith.addf %24, %26 : vector<1x128xf32>
    %28 = vector.shape_cast %27 : vector<1x128xf32> to vector<1x1x128xf32>
    %c0_17 = arith.constant 0 : index
    %c0_18 = arith.constant 0 : index
    %c0_19 = arith.constant 0 : index
    %29 = vector.load %arg8[%c0_17, %c0_18, %c0_19] : memref<1x1x128xf32, #tpu.memory_space<vmem>>, vector<1x1x128xf32>
    tpu.vector_store %arg8[%c0_17, %c0_18, %c0_19], %28 {strides = array<i32>} : memref<1x1x128xf32, #tpu.memory_space<vmem>>, vector<1x1x128xf32>,
    return
  }
  func.func @transform_0(%arg0: i32) -> (i32, i32) {
    %c0_i32 = arith.constant 0 : i32
    %c0_i32_0 = arith.constant 0 : i32
    return %arg0, %c0_i32 : i32, i32
  }
  func.func @transform_1(%arg0: i32) -> (i32, i32) {
    %c0_i32 = arith.constant 0 : i32
    %c0_i32_0 = arith.constant 0 : i32
    %c0_i32_1 = arith.constant 0 : i32
    return %c0_i32, %c0_i32_0 : i32, i32
  }
  func.func @transform_2(%arg0: i32) -> (i32, i32) {
    %c0_i32 = arith.constant 0 : i32
    %c0_i32_0 = arith.constant 0 : i32
    %c0_i32_1 = arith.constant 0 : i32
    return %c0_i32, %c0_i32_0 : i32, i32
  }
  func.func @transform_3(%arg0: i32) -> (i32, i32) {
    %c0_i32 = arith.constant 0 : i32
    %c0_i32_0 = arith.constant 0 : i32
    %c0_i32_1 = arith.constant 0 : i32
    return %c0_i32, %c0_i32_0 : i32, i32
  }
  func.func @transform_4(%arg0: i32) -> (i32, i32) {
    %c0_i32 = arith.constant 0 : i32
    %c0_i32_0 = arith.constant 0 : i32
    %c0_i32_1 = arith.constant 0 : i32
    return %c0_i32, %c0_i32_0 : i32, i32
  }
  func.func @transform_5(%arg0: i32) -> (i32, i32) {
    %c0_i32 = arith.constant 0 : i32
    %c0_i32_0 = arith.constant 0 : i32
    %c0_i32_1 = arith.constant 0 : i32
    return %c0_i32, %c0_i32_0 : i32, i32
  }
  func.func @transform_6(%arg0: i32) -> (i32, i32) {
    %c0_i32 = arith.constant 0 : i32
    %c0_i32_0 = arith.constant 0 : i32
    %c0_i32_1 = arith.constant 0 : i32
    return %c0_i32, %c0_i32_0 : i32, i32
  }
  func.func @transform_7(%arg0: i32) -> (i32, i32, i32) {
    %c0_i32 = arith.constant 0 : i32
    %c0_i32_0 = arith.constant 0 : i32
    %c0_i32_1 = arith.constant 0 : i32
    return %arg0, %c0_i32, %c0_i32_0 : i32, i32, i32
  }
}

</mosaic_0001>

<bundles_post_ra>
// kernel: tpu_custom_call.1
= control target key start
LH: loop header
LB: loop body
LE: loop exit
PB: predicated region body
PF: predicated region fallthrough
CT: control target
= control target key end

     0   :  { %s1080_s0 = inlined_call_operand.vmem [shape: f32[128,32], index: 0, kind: input, shape index: {}]   ;;  %s1081_s1 = inlined_call_operand.vmem [shape: bf16[32,128], index: 1, kind: input, shape index: {}]   ;;  %s1082_s2 = inlined_call_operand.vmem [shape: f32[1,128], index: 2, kind: input, shape index: {}]   ;;  %s1083_s3 = inlined_call_operand.vmem [shape: bf16[128,64], index: 3, kind: input, shape index: {}]   ;;  %s1084_s4 = inlined_call_operand.vmem [shape: f32[1,64], index: 4, kind: input, shape index: {}]   ;;  %s1085_s5 = inlined_call_operand.vmem [shape: f32[1,64], index: 5, kind: input, shape index: {}]   ;;  %s1086_s6 = inlined_call_operand.<no memory space> [shape: f32[1,1], index: 6, kind: input, shape index: {}]   ;;  %s1087_s7 = inlined_call_operand.hbm [shape: f32[1,1,128], index: 7, kind: output, shape index: {}]  }
   0x1   :  { %v12_v0 = vstv %s1086_s6 }
   0x2   :  { %13 = vst [vmem:[#allocation2] sm:$0x1] %v12_v0 }
   0x3   :  { %v784_v1 = vld [vmem:[%s1081_s1] sm:$0xff]   ;;  %v785_v2 = vld [vmem:[%s1081_s1 + $0x8] sm:$0xff]   ;;  %vm78_vm0 = vcmask 261120   ;;  %v33_v6 = vld [vmem:[%s1080_s0 + $0x10] sm:$0xff] }
   0x4   :  { %712 = vmatprep.subr.bf16.mxu0 %v784_v1  ;;  %v31_v3 = vld [vmem:[%s1080_s0] sm:$0xff]  ;;  %v32_v4 = vld [vmem:[%s1080_s0 + $0x8] sm:$0xff]  ;;  %v34_v7 = vld [vmem:[%s1080_s0 + $0x18] sm:$0xff] }
   0x5   :  { %713 = vmatpush3.bf16.msra.mxu0 %v784_v1  ;;  %v47_v5 = vpack.c.bf16 %v32_v4, %v31_v3  ;;  %v35_v8 = vld [vmem:[%s1080_s0 + $0x20] sm:$0xff]  ;;  %v36_v9 = vld [vmem:[%s1080_s0 + $0x28] sm:$0xff]  ;;  %v48_v10 = vpack.c.bf16 %v34_v7, %v33_v6  ;;  %v37_v13 = vld [vmem:[%s1080_s0 + $0x30] sm:$0xff] }
   0x6   :  { %714 = vmatprep.subr.bf16.mxu0 %v785_v2  ;;  %v49_v11 = vpack.c.bf16 %v36_v9, %v35_v8  ;;  %v786_v12 = vld [vmem:[%s1083_s3] sm:$0xff]   ;;  %v38_v14 = vld [vmem:[%s1080_s0 + $0x38] sm:$0xff]  ;;  %v787_v15 = vld [vmem:[%s1083_s3 + $0x8] sm:$0xff]  }
   0x7   :  { %716 = vmatprep.mubr.msk.bf16.mxu0 %vm78_vm0, %v47_v5  ;;  %v39_v16 = vld [vmem:[%s1080_s0 + $0x40] sm:$0xff]  ;;  %v40_v17 = vld [vmem:[%s1080_s0 + $0x48] sm:$0xff]  ;;  %764 = vmatprep.subr.bf16.mxu1 %v786_v12  ;;  %v788_v18 = vld [vmem:[%s1083_s3 + $0x10] sm:$0xff]   ;;  %v50_v19 = vpack.c.bf16 %v38_v14, %v37_v13 }
   0x8   :  { %772 = vmatpush3.bf16.msra.mxu1 %v786_v12 }
   0x9   :  { %715 = vmatpush3.bf16.msra.mxu0 %v785_v2  ;;  %765 = vmatprep.subr.bf16.mxu1 %v787_v15 }
   0xa   :  { %732 = vmatprep.subr.bf16.mxu0 %v786_v12 }
   0xc   :  { %717 = vmatmul.mubr.msk.bf16.vlgmr.msra.gmra.mrb[0].mxu0 %vm78_vm0, %v48_v10 }
   0xd   :  { %720 = vmatprep.mubr.msk.bf16.mxu0 %vm78_vm0, %v49_v11  ;;  %733 = vmatpush3.bf16.msra.mxu0 %v786_v12 }
   0xe   :  { %734 = vmatprep.subr.bf16.mxu0 %v787_v15 }
   0xf   :  { %14 = vsyncpa [#allocation4], 0  ;;  %v51_v20 = vpack.c.bf16 %v40_v17, %v39_v16  ;;  %v789_v21 = vld [vmem:[%s1083_s3 + $0x18] sm:$0xff]   ;;  %773 = vmatpush3.bf16.msra.mxu1 %v787_v15  ;;  %v41_v22 = vld [vmem:[%s1080_s0 + $0x50] sm:$0xff]  ;;  %vm447_vm1 = vcmask 523264   ;;  %vm549_vm2 = vcmask 130112  }
  0x10   :  { %766 = vmatprep.subr.bf16.mxu1 %v788_v18  ;;  %v42_v23 = vld [vmem:[%s1080_s0 + $0x58] sm:$0xff]  ;;  %v43_v24 = vld [vmem:[%s1080_s0 + $0x60] sm:$0xff]  ;;  %v44_v25 = vld [vmem:[%s1080_s0 + $0x68] sm:$0xff]  ;;  %vm556_vm3 = vcmask 195712   ;;  %vm563_vm4 = vcmask 261312   ;;  %vm570_vm5 = vcmask 326912  }
  0x11   :  { %735 = vmatpush3.bf16.msra.mxu0 %v787_v15  ;;  %v790_v26 = vld [vmem:[%s1083_s3 + $0x20] sm:$0xff]   ;;  %v52_v27 = vpack.c.bf16 %v42_v23, %v41_v22  ;;  %v53_v28 = vpack.c.bf16 %v44_v25, %v43_v24  ;;  %v45_v29 = vld [vmem:[%s1080_s0 + $0x70] sm:$0xff]  ;;  %v46_v30 = vld [vmem:[%s1080_s0 + $0x78] sm:$0xff]  ;;  %vm577_vm6 = vcmask 392512   ;;  %vm584_vm7 = vcmask 458112  }
  0x12   :  { %736 = vmatprep.subr.bf16.mxu0 %v788_v18  ;;  %v54_v31 = vpack.c.bf16 %v46_v30, %v45_v29  ;;  %v791_v32 = vld [vmem:[%s1083_s3 + $0x28] sm:$0xff]   ;;  %v792_v33 = vld [vmem:[%s1083_s3 + $0x30] sm:$0xff]   ;;  %v793_v34 = vld [vmem:[%s1083_s3 + $0x38] sm:$0xff]   ;;  %vm591_vm8 = vcmask 523712   ;;  %vm598_vm9 = vcmask 589312   ;;  %vm605_vm10 = vcmask 654912  }
  0x13   :  { %774 = vmatpush3.bf16.msra.mxu1 %v788_v18  ;;  %v665_v36 = vld [vmem:[%s1082_s2] ss:$0 sm:$0xff]  ;;  %vm612_vm11 = vcmask 720512   ;;  %vm619_vm12 = vcmask 786112   ;;  %vm626_vm13 = vcmask 851712   ;;  %vm633_vm14 = vcmask 917312  }
  0x14   :  { %721 = vmatmul.mubr.msk.bf16.gmra.mrb[4].mxu0 %vm78_vm0, %v50_v19  ;;  %767 = vmatprep.subr.bf16.mxu1 %v789_v21  ;;  %v955_v29 = vld [vmem:[%s1084_s4] ss:$0 sm:$0xff]  ;;  %vm640_vm15 = vcmask 982912   ;;  %s819_s4 = smov [#allocation3]  }
  0x15   :  { %724 = vmatprep.mubr.msk.bf16.mxu0 %vm78_vm0, %v51_v20  ;;  %737 = vmatpush3.bf16.msra.mxu0 %v788_v18 }
  0x16   :  { %738 = vmatprep.subr.bf16.mxu0 %v789_v21 }
  0x17   :  { %775 = vmatpush3.bf16.msra.mxu1 %v789_v21 }
  0x18   :  { %768 = vmatprep.subr.bf16.mxu1 %v790_v26 }
  0x19   :  { %739 = vmatpush3.bf16.msra.mxu0 %v789_v21 }
  0x1a   :  { %740 = vmatprep.subr.bf16.mxu0 %v790_v26 }
  0x1b   :  { %776 = vmatpush3.bf16.msra.mxu1 %v790_v26 }
  0x1c   :  { %725 = vmatmul.mubr.msk.bf16.gmra.mrb[8].mxu0 %vm78_vm0, %v52_v27  ;;  %769 = vmatprep.subr.bf16.mxu1 %v791_v32 }
  0x1d   :  { %728 = vmatprep.mubr.msk.bf16.mxu0 %vm78_vm0, %v53_v28  ;;  %741 = vmatpush3.bf16.msra.mxu0 %v790_v26  ;;  %v818_v28 = vmov 0  }
  0x1e   :  { %742 = vmatprep.subr.bf16.mxu0 %v791_v32  ;;  %782 = vset.pattern.permute.xlu1 %v818_v28 }
  0x1f   :  { %777 = vmatpush3.bf16.msra.mxu1 %v791_v32  ;;  %783 = vset.pattern.permute.xlu0 %v818_v28 }
  0x20   :  { %770 = vmatprep.subr.bf16.mxu1 %v792_v33 }
  0x21   :  { %743 = vmatpush3.bf16.msra.mxu0 %v791_v32 }
  0x22   :  { %744 = vmatprep.subr.bf16.mxu0 %v792_v33 }
  0x23   :  { %778 = vmatpush3.bf16.msra.mxu1 %v792_v33 }
  0x24   :  { %729 = vmatmul.mubr.msk.bf16.gmra.mrb[12].mxu0 %vm78_vm0, %v54_v31  ;;  %771 = vmatprep.subr.bf16.mxu1 %v793_v34  ;;  %vm647_vm0 = vcmask 1048512  }
  0x25   :  { %745 = vmatpush3.bf16.msra.mxu0 %v792_v33 }
  0x26   :  { %746 = vmatprep.subr.bf16.mxu0 %v793_v34 }
  0x27   :  { %779 = vmatpush3.bf16.msra.mxu1 %v793_v34 }
  0x29   :  { %747 = vmatpush3.bf16.msra.mxu0 %v793_v34 }
  0xdf   :  { %v718_v35 = vpop.f32.mrb[0].mxu0 }
  0xe0   :  { %v137_v37 = vpop.f32.mrb[1].mxu0  ;;  %v146_v39 = vadd.f32 %v718_v35, %v665_v36 }
  0xe1   :  { %v719_v38 = vpop.f32.mrb[2].mxu0  ;;  %v138_v42 = vadd.f32 %v665_v36, %v137_v37 }
  0xe2   :  { %v149_v40 = vadd.f32 %v719_v38, %v665_v36  ;;  %v140_v41 = vpop.f32.mrb[3].mxu0 }
  0xe3   :  { %v141_v43 = vadd.f32 %v665_v36, %v140_v41 }
  0xe4   :  { %v201_v44 = vpack.c.bf16 %v149_v40, %v146_v39  ;;  %v964_v40 = vld [vmem:[%s1085_s5] ss:$0 sm:$0xff]  ;;  %s657_s5 = sshll.u32 %s819_s4, 4  ;;  %s658_s5 = int_to_ptr.vmem [resolvable:$true] %s657_s5 }
  0xe5   :  { %v200_v45 = vpack.c.bf16 %v141_v43, %v138_v42  ;;  %s794_s8 = scalar_lea.vmem %s658_s5, 16  ;;  %s798_s9 = scalar_lea.vmem %s658_s5, 32 }
  0xe6   :  { %v209_v46 = vmul.bf16 1009007652, %v201_v44  ;;  %p795_p0 = scmp.ne.s32.totalorder %s658_s5, %s794_s8  ;;  %p799_p1 = scmp.lt.s32.totalorder %s658_s5, %s658_s5 }
  0xe7   :  { %v208_v47 = vmul.bf16 1009007652, %v200_v45  ;;  %v722_v48 = vpop.f32.mrb[4].mxu0  ;;  %p800_p2 = scmp.lt.s32.totalorder %s798_s9, %s794_s8 }
  0xe8   :  { %v153_v49 = vpop.f32.mrb[5].mxu0  ;;  %v217_v52 = vmax.bf16 %v209_v46, %v201_v44  ;;  %v162_v53 = vadd.f32 %v722_v48, %v665_v36 }
  0xe9   :  { %v723_v50 = vpop.f32.mrb[6].mxu0  ;;  %v216_v51 = vmax.bf16 %v208_v47, %v200_v45  ;;  %v154_v56 = vadd.f32 %v665_v36, %v153_v49  ;;  %p801_p3 = por %p800_p2, %p799_p1 }
  0xea   :  { %v165_v54 = vadd.f32 %v723_v50, %v665_v36  ;;  %v156_v55 = vpop.f32.mrb[7].mxu0 }
  0xeb   :  { %v157_v57 = vadd.f32 %v665_v36, %v156_v55  ;;  %748 = vmatprep.mubr.bf16.mxu0 %v216_v51  ;;  %p802_p4 = pnand %p801_p3, %p795_p0 }
  0xec   :  { %v203_v58 = vpack.c.bf16 %v165_v54, %v162_v53  ;;  %749 = vmatmul.mubr.bf16.vlgmr.msra.gmra.mrb[16].mxu0 %v217_v52 }
  0xed   :  { %v202_v59 = vpack.c.bf16 %v157_v57, %v154_v56 }
  0xee   :  { %v211_v60 = vmul.bf16 1009007652, %v203_v58 }
  0xef   :  { %v210_v61 = vmul.bf16 1009007652, %v202_v59  ;;  %v726_v62 = vpop.f32.mrb[8].mxu0 }
  0xf0   :  { %v178_v63 = vadd.f32 %v726_v62, %v665_v36  ;;  %v169_v0 = vpop.f32.mrb[9].mxu0  ;;  %v219_v4 = vmax.bf16 %v211_v60, %v203_v58 }
  0xf1   :  { %v218_v1 = vmax.bf16 %v210_v61, %v202_v59  ;;  %v170_v2 = vadd.f32 %v665_v36, %v169_v0  ;;  %v727_v3 = vpop.f32.mrb[10].mxu0 }
  0xf2   :  { %v181_v5 = vadd.f32 %v727_v3, %v665_v36  ;;  %v172_v6 = vpop.f32.mrb[11].mxu0 }
  0xf3   :  { %752 = vmatprep.mubr.bf16.mxu1 %v218_v1  ;;  %v173_v7 = vadd.f32 %v665_v36, %v172_v6 }
  0xf4   :  { %753 = vmatmul.mubr.bf16.vlgmr.msra.gmra.mrb[0].mxu1 %v219_v4  ;;  %v205_v8 = vpack.c.bf16 %v181_v5, %v178_v63 }
  0xf5   :  { %v204_v9 = vpack.c.bf16 %v173_v7, %v170_v2 }
  0xf6   :  { %v213_v10 = vmul.bf16 1009007652, %v205_v8 }
  0xf7   :  { %v212_v11 = vmul.bf16 1009007652, %v204_v9  ;;  %v730_v12 = vpop.f32.mrb[12].mxu0 }
  0xf8   :  { %v194_v13 = vadd.f32 %v730_v12, %v665_v36  ;;  %v185_v14 = vpop.f32.mrb[13].mxu0  ;;  %v221_v15 = vmax.bf16 %v213_v10, %v205_v8 }
  0xf9   :  { %v220_v16 = vmax.bf16 %v212_v11, %v204_v9  ;;  %v186_v17 = vadd.f32 %v665_v36, %v185_v14  ;;  %v731_v18 = vpop.f32.mrb[14].mxu0 }
  0xfa   :  { %v197_v19 = vadd.f32 %v731_v18, %v665_v36  ;;  %v188_v20 = vpop.f32.mrb[15].mxu0 }
  0xfb   :  { %756 = vmatprep.mubr.bf16.mxu1 %v220_v16  ;;  %v189_v21 = vadd.f32 %v665_v36, %v188_v20 }
  0xfc   :  { %757 = vmatmul.mubr.bf16.gmra.mrb[4].mxu1 %v221_v15  ;;  %v207_v22 = vpack.c.bf16 %v197_v19, %v194_v13 }
  0xfd   :  { %v206_v23 = vpack.c.bf16 %v189_v21, %v186_v17 }
  0xfe   :  { %v215_v24 = vmul.bf16 1009007652, %v207_v22 }
  0xff   :  { %v214_v25 = vmul.bf16 1009007652, %v206_v23 }
 0x100   :  { %v223_v26 = vmax.bf16 %v215_v24, %v207_v22 }
 0x101   :  { %v222_v27 = vmax.bf16 %v214_v25, %v206_v23 }
 0x103   :  { %760 = vmatprep.mubr.bf16.mxu1 %v222_v27 }
 0x104   :  { %761 = vmatmul.mubr.bf16.gmra.mrb[8].mxu1 %v223_v26 }
 0x1bf   :  { %v750_v30 = vpop.f32.mrb[16].mxu0 }
 0x1c0   :  { %v338_v31 = vadd.f32 %v750_v30, %v955_v29  ;;  %v329_v32 = vpop.f32.mrb[17].mxu0 }
 0x1c1   :  { %v330_v33 = vadd.f32 %v955_v29, %v329_v32  ;;  %v751_v34 = vpop.f32.mrb[18].mxu0 }
 0x1c2   :  { %v394_v35 = vmul.f32 0.01, %v338_v31  ;;  %v341_v36 = vadd.f32 %v751_v34, %v955_v29  ;;  %v332_v37 = vpop.f32.mrb[19].mxu0 }
 0x1c3   :  { %v392_v38 = vmul.f32 0.01, %v330_v33  ;;  %v333_v39 = vadd.f32 %v955_v29, %v332_v37 }
 0x1c4   :  { %v410_v41 = vmax.f32 %v338_v31, %v394_v35  ;;  %v395_v42 = vmul.f32 0.01, %v341_v36 }
 0x1c5   :  { %v408_v43 = vmax.f32 %v330_v33, %v392_v38  ;;  %v393_v44 = vmul.f32 0.01, %v333_v39 }
 0x1c6   :  { %v411_v45 = vmax.f32 %v341_v36, %v395_v42  ;;  %v433_v46 = vmul.f32 %v964_v40, %v410_v41 }
 0x1c7   :  { %v409_v47 = vmax.f32 %v333_v39, %v393_v44  ;;  %v754_v48 = vpop.f32.mrb[0].mxu1  ;;  %v431_v49 = vmul.f32 %v964_v40, %v408_v43 }
 0x1c8   :  { %v354_v50 = vadd.f32 %v754_v48, %v955_v29  ;;  %v345_v51 = vpop.f32.mrb[1].mxu1  ;;  %v454_v52 = vsel %vm447_vm1, %v433_v46, 0.0  ;;  %v434_v53 = vmul.f32 %v964_v40, %v411_v45 }
 0x1c9   :  { %v346_v54 = vadd.f32 %v955_v29, %v345_v51  ;;  %v755_v55 = vpop.f32.mrb[2].mxu1  ;;  %455 = vadd.xlane.f32.xlu1 %v454_v52  ;;  %v448_v56 = vsel %vm447_vm1, %v431_v49, 0.0  ;;  %v432_v57 = vmul.f32 %v964_v40, %v409_v47 }
 0x1ca   :  { %v398_v58 = vmul.f32 0.01, %v354_v50  ;;  %v357_v59 = vadd.f32 %v755_v55, %v955_v29  ;;  %v348_v60 = vpop.f32.mrb[3].mxu1  ;;  %449 = vadd.xlane.f32.xlu0 %v448_v56  ;;  %v457_v0 = vsel %vm447_vm1, %v434_v53, 0.0 }
 0x1cb   :  { %v396_v61 = vmul.f32 0.01, %v346_v54  ;;  %v349_v62 = vadd.f32 %v955_v29, %v348_v60  ;;  %v451_v4 = vsel %vm447_vm1, %v432_v57, 0.0 }
 0x1cc   :  { %v414_v63 = vmax.f32 %v354_v50, %v398_v58  ;;  %v399_v2 = vmul.f32 0.01, %v357_v59  ;;  %v496_v50 = vld [vmem:[#allocation2] sm:$0x1] }
 0x1cd   :  { %v412_v1 = vmax.f32 %v346_v54, %v396_v61  ;;  %v397_v3 = vmul.f32 0.01, %v349_v62  ;;  %458 = vadd.xlane.f32.xlu1 %v457_v0 }
 0x1ce   :  { %452 = vadd.xlane.f32.xlu0 %v451_v4  ;;  %v437_v5 = vmul.f32 %v964_v40, %v414_v63  ;;  %v415_v11 = vmax.f32 %v357_v59, %v399_v2 }
 0x1cf   :  { %v413_v6 = vmax.f32 %v349_v62, %v397_v3  ;;  %v758_v7 = vpop.f32.mrb[4].mxu1  ;;  %v435_v13 = vmul.f32 %v964_v40, %v412_v1 }
 0x1d0   :  { %v466_v8 = vsel %vm447_vm1, %v437_v5, 0.0  ;;  %v370_v9 = vadd.f32 %v758_v7, %v955_v29  ;;  %v361_v10 = vpop.f32.mrb[5].mxu1  ;;  %v438_v25 = vmul.f32 %v964_v40, %v415_v11  ;;  %v502_v7 = vlaneseq }
 0x1d1   :  { %v436_v12 = vmul.f32 %v964_v40, %v413_v6  ;;  %v362_v14 = vadd.f32 %v955_v29, %v361_v10  ;;  %v759_v15 = vpop.f32.mrb[6].mxu1  ;;  %v460_v24 = vsel %vm447_vm1, %v435_v13, 0.0 }
 0x1d2   :  { %467 = vadd.xlane.f32.xlu0 %v466_v8  ;;  %v402_v16 = vmul.f32 0.01, %v370_v9  ;;  %v373_v17 = vadd.f32 %v759_v15, %v955_v29  ;;  %v364_v18 = vpop.f32.mrb[7].mxu1  ;;  %v469_v35 = vsel %vm447_vm1, %v438_v25, 0.0  ;;  %v1010_v10 = vshrl.u32 %v502_v7, 7 }
 0x1d3   :  { %v463_v19 = vsel %vm447_vm1, %v436_v12, 0.0  ;;  %v400_v20 = vmul.f32 0.01, %v362_v14  ;;  %v365_v21 = vadd.f32 %v955_v29, %v364_v18  ;;  %v1013_v12 = vand.u32 127, %v502_v7 }
 0x1d4   :  { %v418_v22 = vmax.f32 %v370_v9, %v402_v16  ;;  %464 = vadd.xlane.f32.xlu1 %v463_v19  ;;  %v403_v23 = vmul.f32 0.01, %v373_v17  ;;  %v504_v11 = vsub.s32 0, %v1010_v10 }
 0x1d5   :  { %v416_v26 = vmax.f32 %v362_v14, %v400_v20  ;;  %v401_v28 = vmul.f32 0.01, %v365_v21  ;;  %v544_v15 = vadd.s32 4294967288, %v1013_v12  ;;  %v551_v16 = vadd.s32 4294967280, %v1013_v12 }
 0x1d6   :  { %461 = vadd.xlane.f32.xlu0 %v460_v24  ;;  %v419_v27 = vmax.f32 %v373_v17, %v403_v23  ;;  %v441_v30 = vmul.f32 %v964_v40, %v418_v22  ;;  %v542_v20 = vsub.s32 %v1013_v12, %v1010_v10 }
 0x1d7   :  { %v762_v31 = vpop.f32.mrb[8].mxu1  ;;  %v439_v37 = vmul.f32 %v964_v40, %v416_v26  ;;  %v417_v41 = vmax.f32 %v365_v21, %v401_v28  ;;  %v547_v21 = vsub.s32 %v544_v15, %v1010_v10  ;;  %v554_v23 = vsub.s32 %v551_v16, %v1010_v10 }
 0x1d8   :  { %v386_v32 = vadd.f32 %v762_v31, %v955_v29  ;;  %v377_v33 = vpop.f32.mrb[9].mxu1  ;;  %v442_v34 = vmul.f32 %v964_v40, %v419_v27  ;;  %v478_v42 = vsel %vm447_vm1, %v441_v30, 0.0  ;;  %v558_v26 = vadd.s32 4294967272, %v1013_v12 }
 0x1d9   :  { %v763_v36 = vpop.f32.mrb[10].mxu1  ;;  %v378_v44 = vadd.f32 %v955_v29, %v377_v33  ;;  %v472_v45 = vsel %vm447_vm1, %v439_v37, 0.0  ;;  %v440_v48 = vmul.f32 %v964_v40, %v417_v41  ;;  %v565_v30 = vadd.s32 4294967264, %v1013_v12 }
 0x1da   :  { %470 = vadd.xlane.f32.xlu0 %v469_v35  ;;  %v380_v38 = vpop.f32.mrb[11].mxu1  ;;  %v481_v39 = vsel %vm447_vm1, %v442_v34, 0.0  ;;  %v406_v43 = vmul.f32 0.01, %v386_v32  ;;  %v389_v51 = vadd.f32 %v763_v36, %v955_v29  ;;  %v561_v33 = vsub.s32 %v558_v26, %v1010_v10 }
 0x1db   :  { %v404_v47 = vmul.f32 0.01, %v378_v44  ;;  %v381_v49 = vadd.f32 %v955_v29, %v380_v38  ;;  %v475_v53 = vsel %vm447_vm1, %v440_v48, 0.0  ;;  %v572_v34 = vadd.s32 4294967256, %v1013_v12 }
 0x1dc   :  { %v422_v46 = vmax.f32 %v386_v32, %v406_v43  ;;  %v407_v56 = vmul.f32 0.01, %v389_v51  ;;  %v568_v37 = vsub.s32 %v565_v30, %v1010_v10  ;;  %v579_v41 = vadd.s32 4294967248, %v1013_v12 }
 0x1dd   :  { %v420_v52 = vmax.f32 %v378_v44, %v404_v47  ;;  %v405_v54 = vmul.f32 0.01, %v381_v49  ;;  %v575_v44 = vsub.s32 %v572_v34, %v1010_v10  ;;  %v586_v47 = vadd.s32 4294967240, %v1013_v12 }
 0x1de   :  { %479 = vadd.xlane.f32.xlu0 %v478_v42  ;;  %v445_v55 = vmul.f32 %v964_v40, %v422_v46  ;;  %v423_v60 = vmax.f32 %v389_v51, %v407_v56  ;;  %v582_v46 = vsub.s32 %v579_v41, %v1010_v10 }
 0x1df   :  { %v421_v57 = vmax.f32 %v381_v49, %v405_v54  ;;  %v443_v59 = vmul.f32 %v964_v40, %v420_v52 }
 0x1e0   :  { %v490_v58 = vsel %vm447_vm1, %v445_v55, 0.0  ;;  %v446_v63 = vmul.f32 %v964_v40, %v423_v60  ;;  %v589_v55 = vsub.s32 %v586_v47, %v1010_v10 }
 0x1e1   :  { %v484_v61 = vsel %vm447_vm1, %v443_v59, 0.0  ;;  %v444_v29 = vmul.f32 %v964_v40, %v421_v57 }
 0x1e2   :  { %473 = vadd.xlane.f32.xlu0 %v472_v45  ;;  %v493_v0 = vsel %vm447_vm1, %v446_v63, 0.0 }
 0x1e3   :  { %v487_v62 = vsel %vm447_vm1, %v444_v29, 0.0 }
 0x1e5   :  { %499 = vperm.xlu1 %782, %v496_v50   ;;  %v593_v50 = vadd.s32 4294967232, %v1013_v12 }
 0x1e6   :  { %476 = vadd.xlane.f32.xlu0 %v475_v53  ;;  %v600_v53 = vadd.s32 4294967224, %v1013_v12 }
 0x1e8   :  { %v603_v60 = vsub.s32 %v600_v53, %v1010_v10 }
 0x1ea   :  { %491 = vadd.xlane.f32.xlu0 %v490_v58  ;;  %v596_v58 = vsub.s32 %v593_v50, %v1010_v10 }
 0x1ee   :  { %485 = vadd.xlane.f32.xlu0 %v484_v61 }
 0x1f2   :  { %488 = vadd.xlane.f32.xlu0 %v487_v62  ;;  %v607_v62 = vadd.s32 4294967216, %v1013_v12 }
 0x1f4   :  { %v610_v7 = vsub.s32 %v607_v62, %v1010_v10 }
 0x1f6   :  { %494 = vadd.xlane.f32.xlu0 %v493_v0 }
 0x209   :  { %482 = vadd.xlane.f32.xlu1 %v481_v39 }
 0x256   :  { %v456_v4 = vpop.xlane.xlu1 %455 }
 0x257   :  { %v450_v1 = vpop.xlane.xlu0 %449 }
 0x25a   :  { %v459_v6 = vpop.xlane.xlu1 %458 }
 0x25b   :  { %v453_v2 = vpop.xlane.xlu0 %452 }
 0x25f   :  { %v468_v3 = vpop.xlane.xlu0 %467 }
 0x261   :  { %v465_v8 = vpop.xlane.xlu1 %464 }
 0x263   :  { %v462_v5 = vpop.xlane.xlu0 %461 }
 0x265   :  { %v500_v40 = vpop.permute.xlu1 %499 }
 0x266   :  { %v1017_v14 = vrot.slane %v500_v40, %v504_v11  ;;  %v642_v11 = vadd.s32 4294967176, %v1013_v12 }
 0x267   :  { %v471_v9 = vpop.xlane.xlu0 %470 }
 0x268   :  { %v506_v18 = vadd.f32 %v1017_v14, %v450_v1  ;;  %v507_v19 = vadd.f32 %v1017_v14, %v453_v2  ;;  %v508_v22 = vadd.f32 %v1017_v14, %v456_v4  ;;  %v509_v31 = vadd.f32 %v1017_v14, %v459_v6 }
 0x269   :  { %v510_v35 = vadd.f32 %v1017_v14, %v462_v5  ;;  %v511_v42 = vadd.f32 %v1017_v14, %v465_v8  ;;  %v512_v48 = vadd.f32 %v1017_v14, %v468_v3  ;;  %v513_v56 = vadd.f32 %v1017_v14, %v471_v9 }
 0x26a   :  { %v543_v24 = vrot.slane %v506_v18, %v542_v20  ;;  %v548_v25 = vrot.slane %v507_v19, %v547_v21  ;;  %v555_v28 = vrot.slane %v508_v22, %v554_v23  ;;  %v562_v39 = vrot.slane %v509_v31, %v561_v33 }
 0x26b   :  { %v1015_v13 = vpop.xlane.xlu0 %479  ;;  %v569_v45 = vrot.slane %v510_v35, %v568_v37  ;;  %v576_v52 = vrot.slane %v511_v42, %v575_v44  ;;  %v583_v57 = vrot.slane %v512_v48, %v582_v46  ;;  %v590_v0 = vrot.slane %v513_v56, %v589_v55 }
 0x26c   :  { %v550_v32 = vsel %vm549_vm2, %v548_v25, %v543_v24  ;;  %v614_v1 = vadd.s32 4294967208, %v1013_v12  ;;  %v621_v3 = vadd.s32 4294967200, %v1013_v12  ;;  %v628_v6 = vadd.s32 4294967192, %v1013_v12 }
 0x26d   :  { %v557_v36 = vsel %vm556_vm3, %v555_v28, %v550_v32  ;;  %v516_v8 = vadd.f32 %v1017_v14, %v1015_v13  ;;  %v635_v9 = vadd.s32 4294967184, %v1013_v12  ;;  %v645_v25 = vsub.s32 %v642_v11, %v1010_v10 }
 0x26e   :  { %v564_v43 = vsel %vm563_vm4, %v562_v39, %v557_v36  ;;  %v617_v40 = vsub.s32 %v614_v1, %v1010_v10  ;;  %v624_v16 = vsub.s32 %v621_v3, %v1010_v10  ;;  %v631_v21 = vsub.s32 %v628_v6, %v1010_v10 }
 0x26f   :  { %v474_v17 = vpop.xlane.xlu0 %473  ;;  %v571_v49 = vsel %vm570_vm5, %v569_v45, %v564_v43  ;;  %v611_v23 = vrot.slane %v516_v8, %v610_v7  ;;  %v638_v12 = vsub.s32 %v635_v9, %v1010_v10 }
 0x270   :  { %v578_v54 = vsel %vm577_vm6, %v576_v52, %v571_v49  ;;  %v514_v59 = vadd.f32 %v1017_v14, %v474_v17 }
 0x271   :  { %v585_v29 = vsel %vm584_vm7, %v583_v57, %v578_v54 }
 0x272   :  { %v597_v2 = vrot.slane %v514_v59, %v596_v58  ;;  %v592_v4 = vsel %vm591_vm8, %v590_v0, %v585_v29 }
 0x273   :  { %v477_v27 = vpop.xlane.xlu0 %476 }
 0x274   :  { %v515_v61 = vadd.f32 %v1017_v14, %v477_v27  ;;  %v599_v15 = vsel %vm598_vm9, %v597_v2, %v592_v4 }
 0x276   :  { %v604_v5 = vrot.slane %v515_v61, %v603_v60 }
 0x277   :  { %v492_v38 = vpop.xlane.xlu0 %491 }
 0x278   :  { %v606_v20 = vsel %vm605_vm10, %v604_v5, %v599_v15  ;;  %v520_v24 = vadd.f32 %v1017_v14, %v492_v38 }
 0x279   :  { %v613_v30 = vsel %vm612_vm11, %v611_v23, %v606_v20 }
 0x27a   :  { %v639_v33 = vrot.slane %v520_v24, %v638_v12 }
 0x27b   :  { %v486_v51 = vpop.xlane.xlu0 %485 }
 0x27c   :  { %v518_v17 = vadd.f32 %v1017_v14, %v486_v51 }
 0x27e   :  { %v625_v28 = vrot.slane %v518_v17, %v624_v16 }
 0x27f   :  { %v489_v63 = vpop.xlane.xlu0 %488 }
 0x280   :  { %v519_v13 = vadd.f32 %v1017_v14, %v489_v63 }
 0x282   :  { %v632_v31 = vrot.slane %v519_v13, %v631_v21 }
 0x283   :  { %v495_v18 = vpop.xlane.xlu0 %494 }
 0x284   :  { %v521_v26 = vadd.f32 %v1017_v14, %v495_v18 }
 0x286   :  { %v646_v35 = vrot.slane %v521_v26, %v645_v25 }
 0x296   :  { %v483_v19 = vpop.xlane.xlu1 %482 }
 0x297   :  { %v517_v22 = vadd.f32 %v1017_v14, %v483_v19 }
 0x299   :  { %v618_v27 = vrot.slane %v517_v22, %v617_v40 }
 0x29b   :  { %v620_v32 = vsel %vm619_vm12, %v618_v27, %v613_v30 }
 0x29c   :  { %v627_v34 = vsel %vm626_vm13, %v625_v28, %v620_v32 }
 0x29d   :  { %v634_v36 = vsel %vm633_vm14, %v632_v31, %v627_v34 }
 0x29e   :  { %v641_v37 = vsel %vm640_vm15, %v639_v33, %v634_v36 }
 0x29f   :  { %v648_v10 = vsel %vm647_vm0, %v646_v35, %v641_v37 }
 0x2a0   :  { %650 = vst [vmem:[#allocation3] sm:$0x1] %v648_v10 }
 0x2a1   :  { %805 = shalt.err (!%p802_p4)
}
 0x2a2   :  { %s806_s11 = scalar_lea.hbm %s1087_s7, 16 }
 0x2a3   :  { %p807_p5 = scmp.ne.s32.totalorder %s1087_s7, %s806_s11  ;;  %p810_p6 = scmp.lt.u32.totalorder %s806_s11, %s1087_s7 }
 0x2a5   :  { %p812_p7 = pnand %p810_p6, %p807_p5 }
 0x2a7   :  { %815 = shalt.err (!%p812_p7)
}
 0x2a8   :  { %660 = dma.vmem_to_hbm [thread:$0]  %s658_s5, 16, %s1087_s7, [#allocation4]  }
 0x2a9   :  { %816 = dma.done.wait [#allocation4], 16  }
 0x2aa   :  { %817 = vsyncadd [#allocation4], 4294967280 }
 0x2ab   :  { %664 = vsyncpa [#allocation4], 1 }

</bundles_post_ra>
